<compile_context>
chip_gen: v6e
topology: v6e:2x2x1
jax: 0.10.0
libtpu: 0.0.40
codegen_flags: <defaults>
</compile_context>

<pallas_src>
import jax
import jax.numpy as jnp
import numpy as np
from jax.experimental import pallas as pl
from jax.experimental.pallas import tpu as pltpu


def _transition_kernel(a_ref, h_ref, ws_ref, wu_ref, z_ref, v_ref, o_ref):
    """One (bb, dz, tl) slab:  o[i] = A*z[i] + Ws @ relu(z[i] - h) + Wu @ v[i]."""
    A = a_ref[0, 0]                     # scalar decay (SMEM read)
    h = h_ref[...]                      # (dz, 1), broadcast over lanes
    ws = ws_ref[...]                    # (dz, dz)  == (1-A)*W
    wu = wu_ref[...]                    # (dz, du)

    bb = z_ref.shape[0]                 # static batch-rows-per-step
    for i in range(bb):                 # statically unrolled
        z = z_ref[i].astype(jnp.float32)                     # (dz, tl)
        phi = jnp.maximum(z - h, 0.0)                        # relu(z - h)
        rec = jnp.dot(ws, phi, preferred_element_type=jnp.float32)
        inp = jnp.dot(wu, v_ref[i].astype(jnp.float32),
                      preferred_element_type=jnp.float32)
        o_ref[i] = (A * z + rec + inp).astype(o_ref.dtype)


def _round_up(x, m):
    return ((x + m - 1) // m) * m


def transition_fullrank_forward(z, v, W, Wu, h, decay_param, *,
                                tile_lanes=8192, vmem_limit_bytes=None):
    """
    Args:
      z: (B, dz, T, K) latent
      v: (B, du, T, K) input
      W: (dz, dz), Wu: (dz, du), h: (dz,), decay_param: scalar log(-log(decay))
    Returns:
      (B, dz, T, K), same dtype as z.
    """
    B, dz, T, K = z.shape
    du = v.shape[1]
    TK = T * K

    # Free reshapes — keep native memory layout: dz on sublanes, T*K on lanes.
    # No wrapper-side astype (would be a separate full HBM pass).
    z3 = z.reshape(B, dz, TK)
    v3 = v.reshape(B, du, TK)
    out_dtype = z3.dtype

    A0 = jnp.exp(-jnp.exp(jnp.asarray(decay_param, jnp.float32))).reshape(())
    A_smem = A0.reshape(1, 1)                               # scalar via SMEM
    Ws = ((1.0 - A0) * W.astype(jnp.float32))               # fold (1-A) once
    Wu_f = Wu.astype(jnp.float32)
    h2 = h.reshape(dz, 1).astype(jnp.float32)

    # ---- Tiling decisions -------------------------------------------------
    if TK <= tile_lanes:
        # Whole T*K in one lane tile; pack multiple batch rows per grid step.
        tl = TK
        n_j = 1
        lanes_rounded = _round_up(max(TK, 1), 128)
        bb = max(1, min(B, tile_lanes // lanes_rounded))
        # Keep enough evenly split grid steps for megacore balance.
        target_steps = 4 if B >= 4 else min(B, 2)
        while bb > 1 and -(-B // bb) < target_steps:
            bb -= 1
        while bb > 1 and B % bb != 0:   # avoid a partial batch block
            bb -= 1
    else:
        # Stream T*K in tile_lanes chunks (partial tail tile handled by Pallas).
        tl = tile_lanes
        n_j = pl.cdiv(TK, tl)
        bb = 1
    n_b = pl.cdiv(B, bb)

    # ---- Scoped-VMEM budget (only raise the limit if actually needed) -----
    itemsize = jnp.dtype(out_dtype).itemsize
    step_bytes = bb * tl * (2 * dz * itemsize + du * jnp.dtype(v3.dtype).itemsize)
    est_vmem = 2 * step_bytes + 4 * (dz * dz + dz * du + dz) + 4096
    compiler_kwargs = dict(dimension_semantics=("parallel", "parallel"))
    if vmem_limit_bytes is None and est_vmem > 12 * 1024 * 1024:
        vmem_limit_bytes = min(int(est_vmem * 3 // 2), 60 * 1024 * 1024)
    if vmem_limit_bytes is not None:
        compiler_kwargs["vmem_limit_bytes"] = int(vmem_limit_bytes)

    out3 = pl.pallas_call(
        _transition_kernel,
        out_shape=jax.ShapeDtypeStruct((B, dz, TK), out_dtype),
        grid=(n_b, n_j),
        in_specs=[
            pl.BlockSpec(memory_space=pltpu.MemorySpace.SMEM),    # A  (1,1) scalar
            pl.BlockSpec((dz, 1), lambda b, j: (0, 0)),           # h  column
            pl.BlockSpec((dz, dz), lambda b, j: (0, 0)),          # (1-A)*W (stationary)
            pl.BlockSpec((dz, du), lambda b, j: (0, 0)),          # Wu      (stationary)
            pl.BlockSpec((bb, dz, tl), lambda b, j: (b, 0, j)),   # z slab
            pl.BlockSpec((bb, du, tl), lambda b, j: (b, 0, j)),   # v slab
        ],
        out_specs=pl.BlockSpec((bb, dz, tl), lambda b, j: (b, 0, j)),
        compiler_params=pltpu.CompilerParams(**compiler_kwargs),
    )(A_smem, h2, Ws, Wu_f, z3, v3)

    return out3.reshape(B, dz, T, K)


def _reference(z, v, W, Wu, h, decay_param):
    A = jnp.exp(-jnp.exp(decay_param))
    phi = jnp.maximum(z - h[None, :, None, None], 0.0)
    zn = A * z + (1.0 - A) * jnp.einsum('zN,BNTK->BzTK', W, phi)
    zn = zn + jnp.einsum('Nu,BuTK->BNTK', Wu, v)
    return zn


def _make_params(key, dz, du, decay, g):
    k_w, k_wu = jax.random.split(key, 2)
    W = jax.random.normal(k_w, (dz, dz), jnp.float32) * g / np.sqrt(dz)
    Wu = jax.random.uniform(k_wu, (dz, du), jnp.float32,
                            minval=-1.0 / np.sqrt(du), maxval=1.0 / np.sqrt(du))
    h = jnp.zeros((dz,), jnp.float32)                    # relu branch: zeros
    decay_param = jnp.array(np.log(-np.log(decay)), jnp.float32)
    return W, Wu, h, decay_param


if __name__ == "__main__":
    dz, du = 32, 4
    decay = 0.9
    g = float(np.sqrt(2.0))

    key = jax.random.PRNGKey(0)
    k_p, k_z, k_v, k_z2, k_v2, k_z3, k_v3 = jax.random.split(key, 7)
    W, Wu, h, decay_param = _make_params(k_p, dz, du, decay, g)

    # --- main demo shape (matches the module's forward): B=2, T=8, K=16 ----
    B, T, K = 2, 8, 16
    z = jax.random.normal(k_z, (B, dz, T, K), jnp.float32)
    v = jax.random.normal(k_v, (B, du, T, K), jnp.float32)
    out = jax.block_until_ready(transition_fullrank_forward(z, v, W, Wu, h, decay_param))
    ref = _reference(z, v, W, Wu, h, decay_param)
    np.testing.assert_allclose(np.asarray(out), np.asarray(ref), rtol=1e-5, atol=1e-5)

    # --- small T*K, larger B: exercises the multi-batch-rows-per-step path --
    B2, T2, K2 = 8, 4, 8
    z2 = jax.random.normal(k_z2, (B2, dz, T2, K2), jnp.float32)
    v2 = jax.random.normal(k_v2, (B2, du, T2, K2), jnp.float32)
    out2 = jax.block_until_ready(transition_fullrank_forward(z2, v2, W, Wu, h, decay_param))
    ref2 = _reference(z2, v2, W, Wu, h, decay_param)
    np.testing.assert_allclose(np.asarray(out2), np.asarray(ref2), rtol=1e-5, atol=1e-5)

    # --- T*K > tile_lanes with a partial tail tile (forced small tile) ------
    B3, T3, K3 = 2, 10, 32   # TK = 320; tile_lanes=256 -> tiles of 256 + 64 tail
    z3 = jax.random.normal(k_z3, (B3, dz, T3, K3), jnp.float32)
    v3 = jax.random.normal(k_v3, (B3, du, T3, K3), jnp.float32)
    out3 = jax.block_until_ready(
        transition_fullrank_forward(z3, v3, W, Wu, h, decay_param, tile_lanes=256))
    ref3 = _reference(z3, v3, W, Wu, h, decay_param)
    np.testing.assert_allclose(np.asarray(out3), np.asarray(ref3), rtol=1e-5, atol=1e-5)

    print("KERNEL_OK")
</pallas_src>

<mosaic_0001>
module attributes {stable_mosaic.version = 11 : i64} {
  func.func @_transition_kernel(%arg0: i32, %arg1: i32, %arg2: memref<1x1xf32, #tpu.memory_space<smem>>, %arg3: memref<32x1xf32, #tpu.memory_space<vmem>>, %arg4: memref<32x32xf32, #tpu.memory_space<vmem>>, %arg5: memref<32x4xf32, #tpu.memory_space<vmem>>, %arg6: memref<1x32x128xf32, #tpu.memory_space<vmem>>, %arg7: memref<1x4x128xf32, #tpu.memory_space<vmem>>, %arg8: memref<1x32x128xf32, #tpu.memory_space<vmem>>) attributes {dimension_semantics = [#tpu.dimension_semantics<parallel>, #tpu.dimension_semantics<parallel>], iteration_bounds = array<i64: 2, 1>, scalar_prefetch = 0 : i64, scratch_operands = 0 : i64, tpu.core_type = #tpu.core_type<tc>, window_params = [{transform_indices = @transform_0, window_bounds = array<i64: 1, 1>}, {pipeline_mode = #tpu.pipeline_mode<synchronous>, transform_indices = @transform_1, window_bounds = array<i64: 32, 1>}, {pipeline_mode = #tpu.pipeline_mode<synchronous>, transform_indices = @transform_2, window_bounds = array<i64: 32, 32>}, {pipeline_mode = #tpu.pipeline_mode<synchronous>, transform_indices = @transform_3, window_bounds = array<i64: 32, 4>}, {transform_indices = @transform_4, window_bounds = array<i64: 1, 32, 128>}, {transform_indices = @transform_5, window_bounds = array<i64: 1, 4, 128>}, {transform_indices = @transform_6, window_bounds = array<i64: 1, 32, 128>}]} {
    %c0 = arith.constant 0 : index
    %c0_0 = arith.constant 0 : index
    %0 = memref.load %arg2[%c0, %c0_0] : memref<1x1xf32, #tpu.memory_space<smem>>
    %c0_1 = arith.constant 0 : index
    %c0_2 = arith.constant 0 : index
    %1 = vector.load %arg3[%c0_1, %c0_2] : memref<32x1xf32, #tpu.memory_space<vmem>>, vector<32x1xf32>
    %c0_3 = arith.constant 0 : index
    %c0_4 = arith.constant 0 : index
    %2 = vector.load %arg4[%c0_3, %c0_4] : memref<32x32xf32, #tpu.memory_space<vmem>>, vector<32x32xf32>
    %c0_5 = arith.constant 0 : index
    %c0_6 = arith.constant 0 : index
    %3 = vector.load %arg5[%c0_5, %c0_6] : memref<32x4xf32, #tpu.memory_space<vmem>>, vector<32x4xf32>
    %c0_7 = arith.constant 0 : index
    %c0_8 = arith.constant 0 : index
    %c0_9 = arith.constant 0 : index
    %4 = vector.load %arg6[%c0_7, %c0_8, %c0_9] : memref<1x32x128xf32, #tpu.memory_space<vmem>>, vector<1x32x128xf32>
    %5 = vector.shape_cast %4 : vector<1x32x128xf32> to vector<32x128xf32>
    %6 = vector.broadcast %1 : vector<32x1xf32> to vector<32x128xf32>
    %7 = arith.subf %5, %6 : vector<32x128xf32>
    %cst = arith.constant 0.000000e+00 : f32
    %8 = vector.broadcast %cst : f32 to vector<32x128xf32>
    %9 = arith.maximumf %7, %8 : vector<32x128xf32>
    %cst_10 = arith.constant dense<0.000000e+00> : vector<32x128xf32>
    %10 = tpu.matmul %2, %9, %cst_10 {dimension_numbers = #tpu.dot_dimension_numbers<[1], [0], [0], [1], [0, 0, 1, 1], [], []>} : vector<32x32xf32>, vector<32x128xf32>, vector<32x128xf32> -> vector<32x128xf32>
    %c0_11 = arith.constant 0 : index
    %c0_12 = arith.constant 0 : index
    %c0_13 = arith.constant 0 : index
    %11 = vector.load %arg7[%c0_11, %c0_12, %c0_13] : memref<1x4x128xf32, #tpu.memory_space<vmem>>, vector<1x4x128xf32>
    %12 = vector.shape_cast %11 : vector<1x4x128xf32> to vector<4x128xf32>
    %cst_14 = arith.constant dense<0.000000e+00> : vector<32x128xf32>
    %13 = tpu.matmul %3, %12, %cst_14 {dimension_numbers = #tpu.dot_dimension_numbers<[1], [0], [0], [1], [0, 0, 1, 1], [], []>} : vector<32x4xf32>, vector<4x128xf32>, vector<32x128xf32> -> vector<32x128xf32>
    %14 = vector.broadcast %0 : f32 to vector<32x128xf32>
    %15 = arith.mulf %14, %5 : vector<32x128xf32>
    %16 = arith.addf %15, %10 : vector<32x128xf32>
    %17 = arith.addf %16, %13 : vector<32x128xf32>
    %c0_15 = arith.constant 0 : index
    %c0_16 = arith.constant 0 : index
    %c0_17 = arith.constant 0 : index
    %18 = vector.load %arg8[%c0_15, %c0_16, %c0_17] : memref<1x32x128xf32, #tpu.memory_space<vmem>>, vector<1x32x128xf32>
    %19 = vector.shape_cast %18 : vector<1x32x128xf32> to vector<32x128xf32>
    %20 = vector.shape_cast %17 : vector<32x128xf32> to vector<1x32x128xf32>
    tpu.vector_store %arg8[%c0_15, %c0_16, %c0_17], %20 {strides = array<i32>} : memref<1x32x128xf32, #tpu.memory_space<vmem>>, vector<1x32x128xf32>,
    return
  }
  func.func @transform_0(%arg0: i32, %arg1: i32) -> (i32, i32) {
    %c0_i32 = arith.constant 0 : i32
    %c0_i32_0 = arith.constant 0 : i32
    %c0_i32_1 = arith.constant 0 : i32
    return %c0_i32, %c0_i32_0 : i32, i32
  }
  func.func @transform_1(%arg0: i32, %arg1: i32) -> (i32, i32) {
    %c0_i32 = arith.constant 0 : i32
    %c0_i32_0 = arith.constant 0 : i32
    %c0_i32_1 = arith.constant 0 : i32
    return %c0_i32, %c0_i32_0 : i32, i32
  }
  func.func @transform_2(%arg0: i32, %arg1: i32) -> (i32, i32) {
    %c0_i32 = arith.constant 0 : i32
    %c0_i32_0 = arith.constant 0 : i32
    %c0_i32_1 = arith.constant 0 : i32
    return %c0_i32, %c0_i32_0 : i32, i32
  }
  func.func @transform_3(%arg0: i32, %arg1: i32) -> (i32, i32) {
    %c0_i32 = arith.constant 0 : i32
    %c0_i32_0 = arith.constant 0 : i32
    %c0_i32_1 = arith.constant 0 : i32
    return %c0_i32, %c0_i32_0 : i32, i32
  }
  func.func @transform_4(%arg0: i32, %arg1: i32) -> (i32, i32, i32) {
    %c0_i32 = arith.constant 0 : i32
    %c0_i32_0 = arith.constant 0 : i32
    return %arg0, %c0_i32, %arg1 : i32, i32, i32
  }
  func.func @transform_5(%arg0: i32, %arg1: i32) -> (i32, i32, i32) {
    %c0_i32 = arith.constant 0 : i32
    %c0_i32_0 = arith.constant 0 : i32
    return %arg0, %c0_i32, %arg1 : i32, i32, i32
  }
  func.func @transform_6(%arg0: i32, %arg1: i32) -> (i32, i32, i32) {
    %c0_i32 = arith.constant 0 : i32
    %c0_i32_0 = arith.constant 0 : i32
    return %arg0, %c0_i32, %arg1 : i32, i32, i32
  }
}

</mosaic_0001>

<bundles_post_ra>
// kernel: tpu_custom_call.1
= control target key start
LH: loop header
LB: loop body
LE: loop exit
PB: predicated region body
PF: predicated region fallthrough
CT: control target
= control target key end

     0   :  { %s1160_s0 = inlined_call_operand.<no memory space> [shape: f32[1,1], index: 0, kind: input, shape index: {}]   ;;  %s1161_s1 = inlined_call_operand.vmem [shape: f32[32,1], index: 1, kind: input, shape index: {}]   ;;  %s1162_s2 = inlined_call_operand.hbm [shape: f32[32,32], index: 2, kind: input, shape index: {}]   ;;  %s1163_s3 = inlined_call_operand.vmem [shape: f32[32,4], index: 3, kind: input, shape index: {}]   ;;  %s1164_s4 = inlined_call_operand.vmem [shape: f32[2,32,128], index: 4, kind: input, shape index: {}]   ;;  %s1165_s5 = inlined_call_operand.vmem [shape: f32[2,4,128], index: 5, kind: input, shape index: {}]   ;;  %s1166_s6 = inlined_call_operand.hbm [shape: f32[2,32,128], index: 6, kind: output, shape index: {}]  }
   0x1   :  { %11 = sst [smem:[#allocation2]] %s1160_s0 }
   0x2   :  { %12 = vsyncpa [#allocation4], 0 }
   0x3   :  { %13 = vsyncpa [#allocation5], 0 }
   0x4   :  { %15 = vsyncpa [#allocation5 + $0x1], 0  ;;  %s990_s23 = smov 0   ;;  %s992_s24 = smov 0  }
   0x5   :  { %s994_s25 = smov 0   ;;  %s996_s26 = smov 0  }
   0x6   :  { %s998_s27 = smov 0   ;;  %s1000_s28 = smov 0  }
   0x7 LB: > { %s702_s0 = sadd.s32 4294967295, %s943_s28   ;;  %s703_s29 = sadd.s32 4294967294, %s943_s28   ;;  %s943_s28 = sphi %s1000_s28, %s21_s28   ;;  %s939_s27 = sphi %s998_s27, %s1175_s27   ;;  %s935_s26 = sphi %s996_s26, %s1174_s26   ;;  %s931_s25 = sphi %s994_s25, %s1173_s25   ;;  %s927_s24 = sphi %s992_s24, %s1172_s24   ;;  %s923_s23 = sphi %s990_s23, %s1171_s23  }
   0x8   : > { %s33_s30 = sadd.s32 1, %s939_s27  ;;  %s182_s7 = sadd.s32 1, %s931_s25 }
   0x9   : > { %p35_p0 = scmp.ge.s32.totalorder %s33_s30, 2  ;;  %p192_p1 = scmp.ne.s32.totalorder %s931_s25, %s927_s24 }
   0xa   : > { %p193_p2 = scmp.eq.s32.totalorder %s702_s0, 1  ;;  %p198_p3 = scmp.ne.s32.totalorder %s927_s24, %s923_s23 }
   0xb   : > { %s1177_s30 = smov (%p35_p0, %s33_s30), 0  ;;  %p199_p5 = scmp.eq.s32.totalorder %s703_s29, 1 }
   0xc   : > { %p1030_p4 = por %p193_p2, %p192_p1  ;;  %s177_s9 = ssub.s32 %s939_s27, %s1177_s30 }
   0xd   : > { %p704_p6 = scmp.ge.s32.totalorder %s943_s28, 1  ;;  %p180_p7 = scmp.eq.s32.totalorder %s177_s9, 0 }
   0xe   : > { %p1037_p8 = por %p199_p5, %p198_p3  ;;  %p206_p9 = scmp.lt.s32.totalorder %s943_s28, 3 }
   0xf   : > { %s1043_s11 = scalar_select %p180_p7, %s931_s25, %s182_s7  }
  0x10   : > { %p1045_p10 = pnand %p704_p6, %p206_p9  ;;  %p1049_p11 = scmp.eq.s32.totalorder %s702_s0, 0 }
  0x11   : > { %s945_s14 = smov [#allocation3]  }
  0x12   : > { %p770_p12 = pneg %p1045_p10  ;;  %s224_s15 = sshll.u32 %s945_s14, 4  ;;  %s225_s15 = int_to_ptr.vmem [resolvable:$true] %s224_s15 }
  0x13   : > { %s848_s16 = scalar_lea.vmem %s225_s15, 512  ;;  %p856_p5 = scmp.lt.s32.totalorder %s225_s15, %s225_s15 }
  0x14   : > { %p771_p13 = pnand %p1049_p11, %p770_p12  ;;  %p849_p1 = scmp.ne.s32.totalorder %s225_s15, %s848_s16 }
  0x15   : > { %p857_p6 = scmp.lt.s32.totalorder %s848_s16, %s848_s16 }
  0x16   : > { %p839_p0 = pneg %p771_p13 }
  0x17   : > { %p858_p7 = por %p857_p6, %p856_p5 }
  0x18   : > { %p851_p2 = pnand %p849_p1, %p839_p0 }
  0x1a   : > { %p852_p3 = pneg %p851_p2 }
  0x1c   : > { %p859_p9 = pnand %p858_p7, %p852_p3 }
  0x1e   : > { %862 = shalt.err (!%p859_p9)
}
  0x1f   : > { %s946_s17 = smov 128   ;;  %s947_s18 = smov 8  }
  0x20   : > { %773 = dma.hbm_to_vmem [thread:$0]  (!%p771_p13), %s1162_s2, 512, %s225_s15, [#allocation4], %s946_s17, %s946_s17, %s947_s18  }
  0x21   : > { %264 = sbr.rel (%p1045_p10) target bundleno = 396 (0x18c), region = 44 }
  0x26   : > { %914 = dma.done.wait (%p1049_p11), [#allocation4], 512  }
  0x27   : > { %916 = vsyncadd (%p1049_p11), [#allocation4], 4294966784  ;;  %v948_v0 = vmov 0   ;;  %v323_v1 = vld [vmem:[%s1161_s1 + $0x18] sm:$0xff]  ;;  %v321_v2 = vld [vmem:[%s1161_s1 + $0x8] sm:$0xff]  ;;  %p304_p10 = scmp.lt.s32.totalorder %s935_s26, 1 }
  0x28   : > { %836 = vset.pattern.permute.xlu1 %v948_v0  ;;  %835 = vset.pattern.permute.xlu0 %v948_v0  ;;  %v322_v3 = vld [vmem:[%s1161_s1 + $0x10] sm:$0xff]  ;;  %v320_v4 = vld [vmem:[%s1161_s1] sm:$0xff]  ;;  %vm476_vm0 = vcmask 1043456   ;;  %vm364_vm1 = vcmask 261120   ;;  %vm463_vm2 = vcmask 31744   ;;  %v329_v8 = vld [vmem:[%s1163_s3 + $0x8] sm:$0xff] }
  0x29   : > { %353 = vperm.xlu0 %835, %v323_v1   ;;  %343 = vperm.xlu1 %836, %v321_v2   ;;  %s305_s14 = scalar_select %p304_p10, %s935_s26, 1  ;;  %v324_v6 = vld [vmem:[#allocation3] sm:$0xff]  ;;  %v330_v9 = vld [vmem:[%s1163_s3 + $0x10] sm:$0xff]  ;;  %v331_v10 = vld [vmem:[%s1163_s3 + $0x18] sm:$0xff] }
  0x2a   : > { %v328_v7 = vld [vmem:[%s1163_s3] sm:$0xff]  ;;  %750 = vmatprep.mubr.msk.f32.mxu0 %vm364_vm1, %v324_v6  ;;  %v325_v27 = vld [vmem:[#allocation3 + $0x8] sm:$0xff]  ;;  %v326_v28 = vld [vmem:[#allocation3 + $0x10] sm:$0xff]  ;;  %s301_s17 = sand.u32 1, %s927_s24   ;;  %s728_s21 = sshll.u32 %s935_s26, 9 }
  0x2b   : > { %s712_s15 = sshll.u32 %s305_s14, 2  ;;  %758 = vmatprep.mubr.msk.f32.mxu1 %vm463_vm2, %v328_v7  ;;  %s727_s12 = sshll.u32 %s305_s14, 5  ;;  %v327_v29 = vld [vmem:[#allocation3 + $0x18] sm:$0xff] }
  0x2c   : > { %s318_s18 = scalar_lea.vmem %s1165_s5, %s712_s15  ;;  %s311_s16 = scalar_lea.vmem %s1164_s4, %s727_s12 }
  0x2d   : > { %348 = vperm.xlu0 %835, %v322_v3   ;;  %338 = vperm.xlu1 %836, %v320_v4   ;;  %v462_v5 = vld [vmem:[%s318_s18] sm:$0xf]  ;;  %v335_v11 = vld [vmem:[%s311_s16 + $0x18] sm:$0xff]  ;;  %v333_v15 = vld [vmem:[%s311_s16 + $0x8] sm:$0xff]  ;;  %s319_s14 = sld [smem:[#allocation2]]  ;;  %s709_s18 = sshll.u32 %s301_s17, 5 }
  0x2e   : > { %756 = vmatprep.subr.msk.mxu1 %vm476_vm0, %v462_v5  ;;  %v334_v16 = vld [vmem:[%s311_s16 + $0x10] sm:$0xff]  ;;  %v332_v19 = vld [vmem:[%s311_s16] sm:$0xff]  ;;  %s303_s19 = scalar_lea.vmem [#allocation6], %s709_s18  ;;  %s1111_s29 = scalar_lea.hbm %s1166_s6, %s728_s21 }
  0x2f   : > { %757 = vmatpush3.msk.msra.mxu1 %vm476_vm0, %v462_v5  ;;  %s597_s20 = sshll.u32 %s303_s19, 4  ;;  %s1115_s26 = scalar_lea.sflag [#allocation5], %s301_s17  ;;  %s1106_s20 = int_to_ptr.vmem [resolvable:$true] %s597_s20 }
  0x30   : > { %759 = vmatmul.mubr.msk.f32.vlgmr.msra.gmra.mxu1 %vm463_vm2, %v329_v8  ;;  %s863_s7 = scalar_lea.vmem %s1106_s20, 512  ;;  %s949_s9 = smov [#allocation6]  }
  0x31   : > { %761 = vmatprep.mubr.msk.f32.mxu1 %vm463_vm2, %v330_v9  ;;  %p864_p11 = scmp.ne.s32.totalorder %s1106_s20, %s863_s7  ;;  %s867_s12 = sshll.u32 %s949_s9, 4  ;;  %s868_s12 = int_to_ptr.vmem [resolvable:$false] %s867_s12 }
  0x32   : > { %s869_s13 = scalar_lea.vmem %s868_s12, 1024  ;;  %p870_p0 = scmp.lt.s32.totalorder %s1106_s20, %s868_s12 }
  0x33   : > { %v565_v30 = vstv %s319_s14  ;;  %p865_p12 = pnand %p864_p11, %p1030_p4  ;;  %p871_p1 = scmp.lt.s32.totalorder %s869_s13, %s863_s7 }
  0x34   : > { %762 = vmatmul.mubr.msk.f32.gmra.mxu1 %vm463_vm2, %v331_v10  ;;  %v567_v32 = vmul.f32 %v565_v30, %v333_v15  ;;  %v566_v33 = vmul.f32 %v565_v30, %v332_v19  ;;  %v569_v37 = vmul.f32 %v565_v30, %v335_v11  ;;  %v568_v41 = vmul.f32 %v565_v30, %v334_v16 }
  0x35   : > { %p866_p13 = pneg %p865_p12  ;;  %p872_p2 = por %p871_p1, %p870_p0 }
  0x37   : > { %p873_p3 = pnand %p872_p2, %p866_p13 }
  0xa4   : > { %v354_v12 = vpop.permute.xlu0 %353  ;;  %v344_v13 = vpop.permute.xlu1 %343 }
  0xa5   : > { %v359_v14 = vsub.f32 %v335_v11, %v354_v12  ;;  %v357_v21 = vsub.f32 %v333_v15, %v344_v13 }
  0xa7   : > { %v363_v17 = vmax.f32 %v359_v14, 0.0  ;;  %v361_v25 = vmax.f32 %v357_v21, 0.0 }
  0xa8   : > { %v349_v18 = vpop.permute.xlu0 %348  ;;  %v339_v20 = vpop.permute.xlu1 %338 }
  0xa9   : > { %v358_v22 = vsub.f32 %v334_v16, %v349_v18  ;;  %742 = vmatprep.subr.mxu0 %v363_v17  ;;  %v356_v24 = vsub.f32 %v332_v19, %v339_v20 }
  0xaa   : > { %743 = vmatpush3.msra.mxu0 %v363_v17 }
  0xab   : > { %v362_v23 = vmax.f32 %v358_v22, 0.0  ;;  %v360_v26 = vmax.f32 %v356_v24, 0.0 }
  0xad   : > { %744 = vmatprep.subr.mxu0 %v362_v23 }
  0xae   : > { %745 = vmatpush3.msra.mxu0 %v362_v23 }
  0xaf   : > { %746 = vmatprep.subr.mxu0 %v361_v25 }
  0xb0   : > { %747 = vmatpush3.msra.mxu0 %v361_v25 }
  0xb1   : > { %748 = vmatprep.subr.mxu0 %v360_v26 }
  0xb2   : > { %749 = vmatpush3.msra.mxu0 %v360_v26 }
  0xb3   : > { %751 = vmatmul.mubr.msk.f32.vlgmr.msra.gmra.mxu0 %vm364_vm1, %v325_v27 }
  0xb4   : > { %753 = vmatprep.mubr.msk.f32.mxu0 %vm364_vm1, %v326_v28 }
  0xb7   : > { %754 = vmatmul.mubr.msk.f32.gmra.mxu0 %vm364_vm1, %v327_v29 }
  0xf0   : > { %v760_v31 = vpop.f32.mrf.mxu1 }
  0xf2   : > { %v546_v35 = vpop.f32.mrf.mxu1 }
  0xf4   : > { %v763_v43 = vpop.f32.mrf.mxu1 }
  0xf6   : > { %v556_v49 = vpop.f32.mrf.mxu1 }
 0x173   : > { %v752_v34 = vpop.f32.mrf.mxu0 }
 0x174   : > { %v571_v36 = vadd.f32 %v752_v34, %v567_v32 }
 0x175   : > { %v443_v38 = vpop.f32.mrf.mxu0 }
 0x176   : > { %v575_v39 = vadd.f32 %v760_v31, %v571_v36  ;;  %v570_v40 = vadd.f32 %v566_v33, %v443_v38 }
 0x177   : > { %v755_v42 = vpop.f32.mrf.mxu0 }
 0x178   : > { %579 = vst [vmem:[%s303_s19 + $0x8] sm:$0xff] %v575_v39  ;;  %v574_v44 = vadd.f32 %v570_v40, %v546_v35  ;;  %v573_v45 = vadd.f32 %v755_v42, %v569_v37 }
 0x179   : > { %v453_v46 = vpop.f32.mrf.mxu0 }
 0x17a   : > { %578 = vst [vmem:[%s303_s19] sm:$0xff] %v574_v44  ;;  %v577_v47 = vadd.f32 %v763_v43, %v573_v45  ;;  %v572_v48 = vadd.f32 %v568_v41, %v453_v46 }
 0x17c   : > { %581 = vst [vmem:[%s303_s19 + $0x18] sm:$0xff] %v577_v47  ;;  %v576_v50 = vadd.f32 %v572_v48, %v556_v49 }
 0x17e   : > { %580 = vst [vmem:[%s303_s19 + $0x10] sm:$0xff] %v576_v50 }
 0x17f   : > { %876 = shalt.err (!%p873_p3)
}
 0x180   : > { %s877_s15 = scalar_lea.hbm %s1111_s29, 512  ;;  %s881_s17 = scalar_lea.hbm %s1166_s6, 1024 }
 0x181   : > { %p878_p5 = scmp.ne.s32.totalorder %s1111_s29, %s877_s15  ;;  %p882_p9 = scmp.lt.s32.totalorder %s1111_s29, %s1166_s6 }
 0x182   : > { %p883_p10 = scmp.lt.s32.totalorder %s881_s17, %s877_s15 }
 0x183   : > { %p879_p6 = pnand %p878_p5, %p1030_p4 }
 0x184   : > { %p884_p11 = por %p883_p10, %p882_p9 }
 0x185   : > { %p880_p7 = pneg %p879_p6 }
 0x187   : > { %p885_p12 = pnand %p884_p11, %p880_p7 }
 0x189   : > { %888 = shalt.err (!%p885_p12)
}
 0x18a   : > { %s950_s21 = smov 128   ;;  %s951_s22 = smov 8  }
 0x18b   : > { %768 = dma.vmem_to_hbm [thread:$0]  (%p1030_p4), %s1106_s20, 512, %s1111_s29, %s1115_s26, %s950_s21, %s950_s21, %s951_s22  }
 0x18c PF: > { %p780_p13 = scmp.ge.s32.totalorder %s943_s28, 2  ;;  %s612_s0 = sand.u32 1, %s923_s23  }
 0x18d   : > { %s613_s7 = scalar_lea.sflag [#allocation5], %s612_s0 }
 0x18e   : > { %p775_p0 = pnand %p780_p13, %p1037_p8 }
 0x190   : > { %p776_p1 = pneg %p775_p0 }
 0x192   : > { %918 = dma.done.wait (%p776_p1), %s613_s7, 512  }
 0x193   : > { %920 = vsyncadd (%p776_p1), %s613_s7, 4294966784  ;;  %s21_s28 = sadd.s32 1, %s943_s28   ;;  %s1171_s23 = smov %s927_s24 }
 0x194   : > { %p18_p2 = scmp.ge.s32.totalorder %s21_s28, 4   ;;  %s1172_s24 = smov %s931_s25 }
 0x195   : > { %s1173_s25 = smov %s1043_s11  ;;  %s1174_s26 = smov %s939_s27 }
 0x196   : > { %s1175_s27 = smov %s1177_s30  ;;  %20 = sbr.rel (!%p18_p2) target bundleno = 7 (0x7), region = 87 }
 0x19b   :  { %618 = vsyncpa [#allocation4], 1 }
 0x19c   :  { %620 = vsyncpa [#allocation4 + $0x1], 1 }
 0x19d   :  { %621 = vsyncpa [#allocation5], 1 }
 0x19e   :  { %623 = vsyncpa [#allocation5 + $0x1], 1 }

</bundles_post_ra>
